<compile_context>
chip_gen: v7x
topology: tpu7x:2x2x1
jax: 0.10.0
libtpu: 0.0.40
codegen_flags: <defaults>
</compile_context>

<pallas_src>
import functools

import jax
import jax.numpy as jnp
from jax.experimental import pallas as pl
from jax.experimental.pallas import tpu as pltpu


# ----------------------------- kernel helpers --------------------------------


def _se_scale(pooled, w1, b1, w2, b2):
    """Squeeze-excite on the VPU: pooled (Bblk, C) f32 -> sigmoid scale (Bblk, C).

    The 1x1-conv matrices are tiny (C x C/r), so a broadcast-multiply + lane
    reduce on the VPU/XLU beats an MXU round-trip.
    """
    hdn = jnp.sum(pooled[:, None, :] * w1[None, :, :], axis=-1) + b1   # (Bblk, Cr)
    hdn = jnp.where(hdn >= 0, hdn, 0.01 * hdn)   # LeakyReLU, PyTorch default 0.01
    logit = jnp.sum(hdn[:, None, :] * w2[None, :, :], axis=-1) + b2    # (Bblk, C)
    return jax.nn.sigmoid(logit)


# ----------------------------- kernels ---------------------------------------


def fused_kernel(x_ref, w1_ref, b1_ref, w2_ref, b2_ref, o_ref, *, inv_hw):
    """Fused pool + squeeze-excite + rescale on a VMEM-resident (Bblk,C,HW) block."""
    x = x_ref[...]                                        # (Bblk, C, HW) io dtype
    pooled = jnp.sum(x.astype(jnp.float32), axis=2) * inv_hw          # (Bblk, C)
    scale = _se_scale(pooled, w1_ref[...], b1_ref[...], w2_ref[...], b2_ref[...])
    s = scale.astype(x.dtype)                 # bf16 inputs -> bf16 multiply (v6e/v7x)
    o_ref[...] = (x * s[:, :, None]).astype(o_ref.dtype)


def pool_se_kernel(x_ref, w1_ref, b1_ref, w2_ref, b2_ref, scale_ref, acc_ref,
                   *, inv_hw, hw, thw, ragged):
    """Fallback pass 1: tiled global average pool + squeeze-excite.

    Grid (B, nHW); HW axis is the reduction ("arbitrary", innermost).
    Ragged H*W tails are masked in-kernel (no host-side padding copy).
    """
    h = pl.program_id(1)

    @pl.when(h == 0)
    def _():
        acc_ref[...] = jnp.zeros_like(acc_ref)

    x = x_ref[...].astype(jnp.float32)                    # (1, C, thw)
    if ragged:  # static (trace-time) flag: only mask when H*W % thw != 0
        lane = jax.lax.broadcasted_iota(jnp.int32, x.shape, 2)
        x = jnp.where(h * thw + lane < hw, x, 0.0)
    acc_ref[...] += jnp.sum(x, axis=2)                    # (1, C)

    @pl.when(h == pl.num_programs(1) - 1)
    def _():
        pooled = acc_ref[...] * inv_hw
        scale = _se_scale(pooled, w1_ref[...], b1_ref[...], w2_ref[...], b2_ref[...])
        scale_ref[...] = scale[:, :, None].astype(scale_ref.dtype)


def rescale_kernel(x_ref, scale_ref, o_ref):
    """Fallback pass 2: out = x * scale, lane-dense, native-dtype multiply."""
    x = x_ref[...]                                        # (1, C, thw)
    s = scale_ref[...].astype(x.dtype)                    # (1, C, 1)
    o_ref[...] = (x * s).astype(o_ref.dtype)


# ----------------------------- sizing helpers ---------------------------------


def _vmem_budget_bytes():
    """~70% of the chip's per-core VMEM; conservative 64 MiB fallback (v7x)."""
    try:
        cap = int(pltpu.get_tpu_info().vmem_capacity_bytes)
    except Exception:
        cap = 64 << 20
    return int(cap * 0.70)


def _largest_lane_tile(max_elems, hw):
    """Largest multiple of 128 that is <= max_elems and <= ceil(hw/128)*128."""
    hwp = ((hw + 127) // 128) * 128
    t = (max_elems // 128) * 128
    return max(128, min(t, hwp))


# ----------------------------- wrapper -----------------------------------------


def ca_layer(x, w1, b1, w2, b2, *, force_two_pass=False, block_cap_bytes=None):
    """x: (B, C, H, W); w1: (Cr, C); b1: (Cr,); w2: (C, Cr); b2: (C,)."""
    B, C, H, W = x.shape
    Cr = w1.shape[0]
    HW = H * W
    itemsize = x.dtype.itemsize
    inv_hw = 1.0 / HW

    xf = x.reshape(B, C, HW)                         # metadata-only reshape
    w1f = w1.reshape(Cr, C).astype(jnp.float32)
    w2f = w2.reshape(C, Cr).astype(jnp.float32)
    b1f = b1.reshape(1, Cr).astype(jnp.float32)
    b2f = b2.reshape(1, C).astype(jnp.float32)

    budget = _vmem_budget_bytes()

    # ---------------- fused single-pass path (primary) ----------------------
    # Per-image working set: double-buffered input + output blocks plus one
    # f32 temporary for the pooling reduction.
    per_img_ws = C * HW * (4 * itemsize + 4)
    bblk = None
    if not force_two_pass:
        for d in range(B, 0, -1):
            if B % d:
                continue
            if d * per_img_ws + (1 << 20) > budget:
                continue
            if B >= 2 and (B // d) < 2:
                # keep >=2 batch grid steps so v7x megacore gets both cores busy
                continue
            bblk = d
            break

    if bblk is not None:
        out = pl.pallas_call(
            functools.partial(fused_kernel, inv_hw=inv_hw),
            out_shape=jax.ShapeDtypeStruct((B, C, HW), x.dtype),
            grid=(B // bblk,),
            in_specs=[
                pl.BlockSpec((bblk, C, HW), lambda b: (b, 0, 0)),   # x
                pl.BlockSpec((Cr, C), lambda b: (0, 0)),            # w1
                pl.BlockSpec((1, Cr), lambda b: (0, 0)),            # b1
                pl.BlockSpec((C, Cr), lambda b: (0, 0)),            # w2
                pl.BlockSpec((1, C), lambda b: (0, 0)),             # b2
            ],
            out_specs=pl.BlockSpec((bblk, C, HW), lambda b: (b, 0, 0)),
            compiler_params=pltpu.CompilerParams(
                dimension_semantics=("parallel",),
                vmem_limit_bytes=budget),
            cost_estimate=pl.CostEstimate(
                flops=int(3 * B * C * HW + 4 * B * C * Cr),
                transcendentals=int(B * C),
                bytes_accessed=int(2 * B * C * HW * itemsize)),
        )(xf, w1f, b1f, w2f, b2f)
        return out.reshape(B, C, H, W)

    # ---------------- fallback two-pass path (huge H*W) ----------------------
    # One image per block; pass 1 tiles H*W for the reduction, pass 2 picks
    # its own (larger) lane-dense tile since it has no residency constraint.
    cap1 = block_cap_bytes if block_cap_bytes else min(8 << 20, budget // 4)
    thw1 = _largest_lane_tile(cap1 // (C * itemsize), HW)
    n1 = pl.cdiv(HW, thw1)
    ragged1 = (HW % thw1) != 0

    scale = pl.pallas_call(
        functools.partial(pool_se_kernel, inv_hw=inv_hw, hw=HW, thw=thw1,
                          ragged=ragged1),
        out_shape=jax.ShapeDtypeStruct((B, C, 1), jnp.float32),
        grid=(B, n1),
        in_specs=[
            pl.BlockSpec((1, C, thw1), lambda b, h: (b, 0, h)),     # x tile
            pl.BlockSpec((Cr, C), lambda b, h: (0, 0)),             # w1
            pl.BlockSpec((1, Cr), lambda b, h: (0, 0)),             # b1
            pl.BlockSpec((C, Cr), lambda b, h: (0, 0)),             # w2
            pl.BlockSpec((1, C), lambda b, h: (0, 0)),              # b2
        ],
        out_specs=pl.BlockSpec((1, C, 1), lambda b, h: (b, 0, 0)),
        scratch_shapes=[pltpu.VMEM((1, C), jnp.float32)],
        compiler_params=pltpu.CompilerParams(
            dimension_semantics=("parallel", "arbitrary"),
            vmem_limit_bytes=budget),
        cost_estimate=pl.CostEstimate(
            flops=int(2 * B * C * HW + 4 * B * C * Cr),
            transcendentals=int(B * C),
            bytes_accessed=int(B * C * HW * itemsize)),
    )(xf, w1f, b1f, w2f, b2f)

    cap2 = block_cap_bytes if block_cap_bytes else min(8 << 20, budget // 5)
    thw2 = _largest_lane_tile(cap2 // (C * itemsize), HW)
    n2 = pl.cdiv(HW, thw2)

    out = pl.pallas_call(
        rescale_kernel,
        out_shape=jax.ShapeDtypeStruct((B, C, HW), x.dtype),
        grid=(B, n2),
        in_specs=[
            pl.BlockSpec((1, C, thw2), lambda b, h: (b, 0, h)),     # x tile
            pl.BlockSpec((1, C, 1), lambda b, h: (b, 0, 0)),        # scale
        ],
        out_specs=pl.BlockSpec((1, C, thw2), lambda b, h: (b, 0, h)),
        compiler_params=pltpu.CompilerParams(
            dimension_semantics=("parallel", "parallel"),
            vmem_limit_bytes=budget),
        cost_estimate=pl.CostEstimate(
            flops=int(B * C * HW),
            transcendentals=0,
            bytes_accessed=int(2 * B * C * HW * itemsize)),
    )(xf, scale)
    return out.reshape(B, C, H, W)


# ----------------------------- reference & test -------------------------------


def reference(x, w1, b1, w2, b2):
    y = jnp.mean(x.astype(jnp.float32), axis=(2, 3), keepdims=True)   # (B,C,1,1)
    y = jnp.einsum("oc,bcij->boij", w1, y) + b1[None, :, None, None]
    y = jnp.where(y >= 0, y, 0.01 * y)
    y = jnp.einsum("oc,bcij->boij", w2, y) + b2[None, :, None, None]
    y = jax.nn.sigmoid(y)
    return x.astype(jnp.float32) * y


if __name__ == "__main__":
    # Shapes consistent with the module: channel=32, reduction=16 -> Cr=2.
    B, C, H, W = 2, 32, 16, 16
    reduction = 16
    Cr = C // reduction

    key = jax.random.PRNGKey(0)
    kx, k1, k2, k3, k4 = jax.random.split(key, 5)
    x = jax.random.normal(kx, (B, C, H, W), dtype=jnp.float32)
    w1 = jax.random.normal(k1, (Cr, C), dtype=jnp.float32) * 0.1
    b1 = jax.random.normal(k2, (Cr,), dtype=jnp.float32) * 0.1
    w2 = jax.random.normal(k3, (C, Cr), dtype=jnp.float32) * 0.1
    b2 = jax.random.normal(k4, (C,), dtype=jnp.float32) * 0.1

    ref = reference(x, w1, b1, w2, b2)

    # 1) primary fused path (single HBM read of x, single write of out)
    out = jax.block_until_ready(ca_layer(x, w1, b1, w2, b2))
    assert out.shape == (B, C, H, W)
    assert jnp.allclose(out, ref, atol=1e-5, rtol=1e-5), "fused path mismatch"

    # 2) fallback two-pass path (forced, small tiles) — exercises the tiled
    #    pooling accumulator + separate rescale pass.
    out2 = jax.block_until_ready(
        ca_layer(x, w1, b1, w2, b2, force_two_pass=True,
                 block_cap_bytes=C * 128 * x.dtype.itemsize))
    assert jnp.allclose(out2, ref, atol=1e-5, rtol=1e-5), "two-pass path mismatch"

    # 3) bf16 input: rescale multiply stays in bf16 (pool/SE in f32).
    xb = x.astype(jnp.bfloat16)
    out3 = jax.block_until_ready(ca_layer(xb, w1, b1, w2, b2))
    ref3 = reference(xb, w1, b1, w2, b2)
    assert out3.dtype == jnp.bfloat16
    assert jnp.allclose(out3.astype(jnp.float32), ref3, atol=5e-2, rtol=5e-2), \
        "bf16 path mismatch"

    print("KERNEL_OK")
</pallas_src>

<mosaic_0001>
module attributes {stable_mosaic.version = 11 : i64} {
  func.func @fused_kernel(%arg0: i32, %arg1: memref<1x32x256xf32, #tpu.memory_space<vmem>>, %arg2: memref<2x32xf32, #tpu.memory_space<vmem>>, %arg3: memref<1x2xf32, #tpu.memory_space<vmem>>, %arg4: memref<32x2xf32, #tpu.memory_space<vmem>>, %arg5: memref<1x32xf32, #tpu.memory_space<vmem>>, %arg6: memref<1x32x256xf32, #tpu.memory_space<vmem>>) attributes {dimension_semantics = [#tpu.dimension_semantics<parallel>], iteration_bounds = array<i64: 2>, scalar_prefetch = 0 : i64, scratch_operands = 0 : i64, tpu.core_type = #tpu.core_type<tc>, window_params = [{transform_indices = @transform_0, window_bounds = array<i64: 1, 32, 256>}, {pipeline_mode = #tpu.pipeline_mode<synchronous>, transform_indices = @transform_1, window_bounds = array<i64: 2, 32>}, {pipeline_mode = #tpu.pipeline_mode<synchronous>, transform_indices = @transform_2, window_bounds = array<i64: 1, 2>}, {pipeline_mode = #tpu.pipeline_mode<synchronous>, transform_indices = @transform_3, window_bounds = array<i64: 32, 2>}, {pipeline_mode = #tpu.pipeline_mode<synchronous>, transform_indices = @transform_4, window_bounds = array<i64: 1, 32>}, {transform_indices = @transform_5, window_bounds = array<i64: 1, 32, 256>}]} {
    %c0 = arith.constant 0 : index
    %c0_0 = arith.constant 0 : index
    %c0_1 = arith.constant 0 : index
    %0 = vector.load %arg1[%c0, %c0_0, %c0_1] : memref<1x32x256xf32, #tpu.memory_space<vmem>>, vector<1x32x256xf32>
    %cst = arith.constant dense<0.000000e+00> : vector<1x32xf32>
    %1 = vector.multi_reduction <add>, %0, %cst [2] : vector<1x32x256xf32> to vector<1x32xf32>
    %cst_2 = arith.constant 3.906250e-03 : f32
    %2 = vector.broadcast %cst_2 : f32 to vector<1x32xf32>
    %3 = arith.mulf %1, %2 : vector<1x32xf32>
    %c0_3 = arith.constant 0 : index
    %c0_4 = arith.constant 0 : index
    %4 = vector.load %arg2[%c0_3, %c0_4] : memref<2x32xf32, #tpu.memory_space<vmem>>, vector<2x32xf32>
    %c0_5 = arith.constant 0 : index
    %c0_6 = arith.constant 0 : index
    %5 = vector.load %arg3[%c0_5, %c0_6] : memref<1x2xf32, #tpu.memory_space<vmem>>, vector<1x2xf32>
    %c0_7 = arith.constant 0 : index
    %c0_8 = arith.constant 0 : index
    %6 = vector.load %arg4[%c0_7, %c0_8] : memref<32x2xf32, #tpu.memory_space<vmem>>, vector<32x2xf32>
    %c0_9 = arith.constant 0 : index
    %c0_10 = arith.constant 0 : index
    %7 = vector.load %arg5[%c0_9, %c0_10] : memref<1x32xf32, #tpu.memory_space<vmem>>, vector<1x32xf32>
    %8 = vector.shape_cast %3 : vector<1x32xf32> to vector<1x1x32xf32>
    %9 = vector.shape_cast %4 : vector<2x32xf32> to vector<1x2x32xf32>
    %10 = vector.broadcast %8 : vector<1x1x32xf32> to vector<1x2x32xf32>
    %11 = arith.mulf %10, %9 : vector<1x2x32xf32>
    %cst_11 = arith.constant dense<0.000000e+00> : vector<1x2xf32>
    %12 = vector.multi_reduction <add>, %11, %cst_11 [2] : vector<1x2x32xf32> to vector<1x2xf32>
    %13 = arith.addf %12, %5 : vector<1x2xf32>
    %cst_12 = arith.constant 0.000000e+00 : f32
    %14 = vector.broadcast %cst_12 : f32 to vector<1x2xf32>
    %15 = arith.cmpf oge, %13, %14 : vector<1x2xf32>
    %cst_13 = arith.constant 0.00999999977 : f32
    %16 = vector.broadcast %cst_13 : f32 to vector<1x2xf32>
    %17 = arith.mulf %16, %13 : vector<1x2xf32>
    %18 = arith.select %15, %13, %17 : vector<1x2xi1>, vector<1x2xf32>
    %19 = vector.shape_cast %18 : vector<1x2xf32> to vector<1x1x2xf32>
    %20 = vector.shape_cast %6 : vector<32x2xf32> to vector<1x32x2xf32>
    %21 = vector.broadcast %19 : vector<1x1x2xf32> to vector<1x32x2xf32>
    %22 = arith.mulf %21, %20 : vector<1x32x2xf32>
    %cst_14 = arith.constant dense<0.000000e+00> : vector<1x32xf32>
    %23 = vector.multi_reduction <add>, %22, %cst_14 [2] : vector<1x32x2xf32> to vector<1x32xf32>
    %24 = arith.addf %23, %7 : vector<1x32xf32>
    %25 = arith.negf %24 : vector<1x32xf32>
    %26 = math.exp %25 : vector<1x32xf32>
    %cst_15 = arith.constant 1.000000e+00 : f32
    %27 = vector.broadcast %cst_15 : f32 to vector<1x32xf32>
    %28 = arith.addf %27, %26 : vector<1x32xf32>
    %29 = arith.divf %27, %28 : vector<1x32xf32>
    %30 = vector.shape_cast %29 : vector<1x32xf32> to vector<1x32x1xf32>
    %31 = vector.broadcast %30 : vector<1x32x1xf32> to vector<1x32x256xf32>
    %32 = arith.mulf %0, %31 : vector<1x32x256xf32>
    %c0_16 = arith.constant 0 : index
    %c0_17 = arith.constant 0 : index
    %c0_18 = arith.constant 0 : index
    %33 = vector.load %arg6[%c0_16, %c0_17, %c0_18] : memref<1x32x256xf32, #tpu.memory_space<vmem>>, vector<1x32x256xf32>
    tpu.vector_store %arg6[%c0_16, %c0_17, %c0_18], %32 {strides = array<i32>} : memref<1x32x256xf32, #tpu.memory_space<vmem>>, vector<1x32x256xf32>,
    return
  }
  func.func @transform_0(%arg0: i32) -> (i32, i32, i32) {
    %c0_i32 = arith.constant 0 : i32
    %c0_i32_0 = arith.constant 0 : i32
    %c0_i32_1 = arith.constant 0 : i32
    return %arg0, %c0_i32, %c0_i32_0 : i32, i32, i32
  }
  func.func @transform_1(%arg0: i32) -> (i32, i32) {
    %c0_i32 = arith.constant 0 : i32
    %c0_i32_0 = arith.constant 0 : i32
    %c0_i32_1 = arith.constant 0 : i32
    return %c0_i32, %c0_i32_0 : i32, i32
  }
  func.func @transform_2(%arg0: i32) -> (i32, i32) {
    %c0_i32 = arith.constant 0 : i32
    %c0_i32_0 = arith.constant 0 : i32
    %c0_i32_1 = arith.constant 0 : i32
    return %c0_i32, %c0_i32_0 : i32, i32
  }
  func.func @transform_3(%arg0: i32) -> (i32, i32) {
    %c0_i32 = arith.constant 0 : i32
    %c0_i32_0 = arith.constant 0 : i32
    %c0_i32_1 = arith.constant 0 : i32
    return %c0_i32, %c0_i32_0 : i32, i32
  }
  func.func @transform_4(%arg0: i32) -> (i32, i32) {
    %c0_i32 = arith.constant 0 : i32
    %c0_i32_0 = arith.constant 0 : i32
    %c0_i32_1 = arith.constant 0 : i32
    return %c0_i32, %c0_i32_0 : i32, i32
  }
  func.func @transform_5(%arg0: i32) -> (i32, i32, i32) {
    %c0_i32 = arith.constant 0 : i32
    %c0_i32_0 = arith.constant 0 : i32
    %c0_i32_1 = arith.constant 0 : i32
    return %arg0, %c0_i32, %c0_i32_0 : i32, i32, i32
  }
}

</mosaic_0001>

<bundles_post_ra>
// kernel: tpu_custom_call.1
= control target key start
LH: loop header
LB: loop body
LE: loop exit
PB: predicated region body
PF: predicated region fallthrough
CT: control target
= control target key end

     0   :  { %10 = vsyncpa [#allocation3], 0  ;;  %s1821_s0 = inlined_call_operand.hbm [shape: f32[2,32,256], index: 0, kind: input, shape index: {}]   ;;  %s1822_s1 = inlined_call_operand.vmem [shape: f32[2,32], index: 1, kind: input, shape index: {}]   ;;  %s1823_s2 = inlined_call_operand.vmem [shape: f32[1,2], index: 2, kind: input, shape index: {}]   ;;  %s1824_s3 = inlined_call_operand.vmem [shape: f32[32,2], index: 3, kind: input, shape index: {}]   ;;  %s1825_s4 = inlined_call_operand.vmem [shape: f32[1,32], index: 4, kind: input, shape index: {}]   ;;  %s1826_s5 = inlined_call_operand.hbm [shape: f32[2,32,256], index: 5, kind: output, shape index: {}]  }
   0x1   :  { %12 = vsyncpa [#allocation3 + $0x1], 0 }
   0x2   :  { %13 = vsyncpa [#allocation4], 0 }
   0x3   :  { %15 = vsyncpa [#allocation4 + $0x1], 0  ;;  %s1427_s18 = smov 0   ;;  %s1429_s19 = smov 0  }
   0x4   :  { %s1431_s20 = smov 0   ;;  %s1433_s21 = smov 0  }
   0x5 LB: > { %s1448_s22 = sadd.s32 4294967295, %s1388_s21   ;;  %s1201_s23 = sadd.s32 4294967294, %s1388_s21   ;;  %s1388_s21 = sphi %s1433_s21, %s1839_s21   ;;  %s1384_s20 = sphi %s1431_s20, %s1838_s20   ;;  %s1380_s19 = sphi %s1429_s19, %s1837_s19   ;;  %s1376_s18 = sphi %s1427_s18, %s1836_s18  }
   0x6   : > { %s1452_s24 = sadd.s32 1, %s1388_s21   ;;  %s28_s25 = sadd.s32 1, %s1384_s20 }
   0x7   : > { %s25_s26 = ssub.s32 %s1388_s21, %s1452_s24  ;;  %p35_p0 = scmp.ne.s32.totalorder %s1384_s20, %s1380_s19 }
   0x8   : > { %p26_p1 = scmp.eq.s32.totalorder %s25_s26, 0  ;;  %p36_p2 = scmp.eq.s32.totalorder %s1388_s21, 0 }
   0x9   : > { %p41_p3 = scmp.ne.s32.totalorder %s1380_s19, %s1376_s18  ;;  %p42_p4 = scmp.eq.s32.totalorder %s1448_s22, 0 }
   0xa   : > { %s1464_s27 = scalar_select %p26_p1, %s1384_s20, %s28_s25  }
   0xb   : > { %p1466_p5 = por %p36_p2, %p35_p0  ;;  %p1470_p6 = por %p42_p4, %p41_p3 }
   0xc   : > { %p149_p7 = scmp.eq.s32.totalorder %s1448_s22, 1  ;;  %p155_p8 = scmp.eq.s32.totalorder %s1201_s23, 1 }
   0xd   : > { %p1235_p10 = scmp.lt.s32.totalorder %s1388_s21, 2  ;;  %s187_s7 = sand.u32 1, %s1384_s20  }
   0xe   : > { %p1477_p11 = por %p149_p7, %p35_p0  ;;  %p1481_p12 = por %p155_p8, %p41_p3 }
   0xf   : > { %s1221_s8 = sshll.u32 %s1388_s21, 10  ;;  %s1204_s9 = sshll.u32 %s187_s7, 6 }
  0x10   : > { %s1830_s30 = scalar_select %p1477_p11, 1, 0 }
  0x11   : > { %s1831_s6 = scalar_select %p1481_p12, 1, 0 }
  0x12   : > { %s1490_s12 = scalar_lea.hbm %s1821_s0, %s1221_s8  ;;  %s191_s13 = scalar_lea.vmem [#allocation2], %s1204_s9 }
  0x13   : > { %s198_s14 = sshll.u32 %s191_s13, 4  ;;  %p1494_p13 = pnand %p1235_p10, %p1466_p5  ;;  %s1498_s14 = int_to_ptr.vmem [resolvable:$true] %s198_s14 }
  0x14   : > { %s1500_s16 = scalar_lea.sflag [#allocation3], %s187_s7  ;;  %s1292_s17 = scalar_lea.hbm %s1490_s12, 1024 }
  0x15   : > { %p1293_p0 = scmp.ne.s32.totalorder %s1490_s12, %s1292_s17  ;;  %p1294_p1 = pneg %p1494_p13 }
  0x16   : > { %s1297_s26 = scalar_lea.hbm %s1821_s0, 2048  ;;  %p1298_p4 = scmp.lt.u32.totalorder %s1490_s12, %s1821_s0 }
  0x17   : > { %p1295_p2 = pnand %p1294_p1, %p1293_p0  ;;  %p1299_p5 = scmp.lt.u32.totalorder %s1297_s26, %s1292_s17 }
  0x18   : > { %p1301_p8 = scmp.lt.u32.totalorder %s1292_s17, %s1490_s12 }
  0x19   : > { %p1296_p3 = pneg %p1295_p2  ;;  %p1300_p7 = por %p1299_p5, %p1298_p4 }
  0x1b   : > { %p1302_p10 = por %p1301_p8, %p1300_p7 }
  0x1d   : > { %p1303_p9 = pnand %p1302_p10, %p1296_p3 }
  0x1f   : > { %1306 = shalt.err (!%p1303_p9)
}
  0x20   : > { %s1307_s7 = scalar_lea.vmem %s1498_s14, 1024  ;;  %s1390_s9 = smov [#allocation2]  }
  0x21   : > { %p1308_p0 = scmp.ne.s32.totalorder %s1498_s14, %s1307_s7  ;;  %s1312_s10 = sshll.u32 %s1390_s9, 4  ;;  %s1313_s10 = int_to_ptr.vmem [resolvable:$false] %s1312_s10 }
  0x22   : > { %s1314_s11 = scalar_lea.vmem %s1313_s10, 2048  ;;  %p1315_p11 = scmp.lt.s32.totalorder %s1498_s14, %s1313_s10 }
  0x23   : > { %p1310_p2 = pnand %p1308_p0, %p1294_p1  ;;  %p1316_p4 = scmp.lt.s32.totalorder %s1314_s11, %s1307_s7 }
  0x25   : > { %p1311_p12 = pneg %p1310_p2  ;;  %p1317_p5 = por %p1316_p4, %p1315_p11 }
  0x27   : > { %p1318_p7 = pnand %p1317_p5, %p1311_p12 }
  0x29   : > { %1321 = shalt.err (!%p1318_p7)
}
  0x2a   : > { %s1391_s13 = smov 256   ;;  %s1392_s17 = smov 16  }
  0x2b   : > { %1230 = dma.hbm_to_vmem [thread:$0]  (!%p1494_p13), %s1490_s12, 1024, %s1498_s14, %s1500_s16, %s1391_s13, %s1391_s13, %s1392_s17  }
  0x2c   : > { %p1207_p9 = scmp.ge.s32.totalorder %s1388_s21, 1  ;;  %p206_p1 = scmp.lt.s32.totalorder %s1388_s21, 3 }
  0x2e   : > { %p207_p3 = pnand %p1207_p9, %p206_p1 }
  0x2f   : > { %s1531_s23 = sand.u32 (!%p207_p3), 1, %s1380_s19  }
  0x30   : > { %210 = sbr.rel (%p207_p3) target bundleno = 1021 (0x3fd), region = 40  ;;  %s1208_s25 = sshll.u32 (!%p207_p3), %s1531_s23, 6 }
  0x31   : > { %s213_s26 = scalar_lea.sflag (!%p207_p3), [#allocation3], %s1531_s23  ;;  %s216_s28 = scalar_lea.vmem (!%p207_p3), [#allocation2], %s1208_s25 }
  0x37   : > { %1367 = dma.done.wait (%p1470_p6), %s213_s26, 1024  }
  0x38   : > { %1369 = vsyncadd (%p1470_p6), %s213_s26, 4294966272  ;;  %v1541_v0 = vld [vmem:[%s216_s28 + $0x20] sm:$0xff]  ;;  %v1543_v1 = vld [vmem:[%s216_s28 + $0x28] sm:$0xff]  ;;  %v275_v12 = vlaneseq  ;;  %v1393_v19 = vmov 0   ;;  %vm372_vm0 = vcmask 130112   ;;  %vm379_vm1 = vcmask 195712  }
  0x39   : > { %v1545_v2 = vld [vmem:[%s216_s28] sm:$0xff]  ;;  %v257_v3 = vadd.f32 %v1543_v1, %v1541_v0  ;;  %v1549_v4 = vld [vmem:[%s216_s28 + $0x8] sm:$0xff]  ;;  %v1551_v5 = vld [vmem:[%s216_s28 + $0x30] sm:$0xff]  ;;  %1275 = vset.pattern.permute.xlu1 %v1393_v19  ;;  %1274 = vset.pattern.permute.xlu0 %v1393_v19  ;;  %vm386_vm2 = vcmask 261312   ;;  %vm407_vm3 = vcmask 1041409   ;;  %vm410_vm4 = vcmask 254976  }
  0x3a   : > { %v1553_v6 = vld [vmem:[%s216_s28 + $0x38] sm:$0xff]  ;;  %v251_v7 = vadd.f32 %v1549_v4, %v1545_v2  ;;  %v1557_v8 = vld [vmem:[%s216_s28 + $0x10] sm:$0xff]  ;;  %v1566_v13 = vshrl.u32 %v275_v12, 7  ;;  %v267_v15 = vld [vmem:[%s1822_s1] sm:$0x3]  ;;  %vm976_vm6 = vcmask 1042434  }
  0x3b   : > { %v1559_v9 = vld [vmem:[%s216_s28 + $0x18] sm:$0xff]  ;;  %258 = vadd.xlane.f32.xlu1 %v257_v3  ;;  %v260_v10 = vadd.f32 %v1553_v6, %v1551_v5  ;;  %v269_v41 = vld [vmem:[%s1824_s3] sm:$0xff]  ;;  %v271_v47 = vld [vmem:[%s1824_s3 + $0x10] sm:$0xff]  ;;  %vm978_vm7 = vcmask 1043459   ;;  %vm980_vm8 = vcmask 1044484   ;;  %vm982_vm9 = vcmask 1045509  }
  0x3c   : > { %252 = vadd.xlane.f32.xlu0 %v251_v7  ;;  %v254_v11 = vadd.f32 %v1559_v9, %v1557_v8  ;;  %v1569_v14 = vsub.s32 0, %v1566_v13  ;;  %v1576_v17 = vsub.s32 1, %v1566_v13  ;;  %v447_v39 = vsub.s32 2, %v1566_v13  ;;  %v1210_v51 = vld [vmem:[%s1823_s2] ss:$0 sm:$0xff]  ;;  %v270_v57 = vld [vmem:[%s1824_s3 + $0x8] sm:$0xff] }
  0x3d   : > { %v454_v45 = vsub.s32 3, %v1566_v13  ;;  %v461_v50 = vsub.s32 4, %v1566_v13  ;;  %v468_v55 = vsub.s32 5, %v1566_v13  ;;  %v475_v61 = vsub.s32 6, %v1566_v13  ;;  %s242_s29 = scalar_lea.vmem [#allocation5], %s1208_s25  ;;  %s1222_s14 = sshll.u32 %s1448_s22, 10 }
  0x3e   : > { %v278_v16 = vrot.slane %v267_v15, %v1569_v14  ;;  %v297_v18 = vrot.slane %v267_v15, %v1576_v17  ;;  %v448_v44 = vrot.slane %v269_v41, %v447_v39  ;;  %v434_v53 = vrot.slane %v269_v41, %v1569_v14  ;;  %v272_v15 = vld [vmem:[%s1824_s3 + $0x18] sm:$0xff]  ;;  %s1128_s12 = sshll.u32 %s242_s29, 4  ;;  %s1775_s16 = scalar_lea.hbm %s1826_s5, %s1222_s14  ;;  %s1768_s12 = int_to_ptr.vmem [resolvable:$true] %s1128_s12 }
  0x3f   : > { %261 = vadd.xlane.f32.xlu1 %v260_v10  ;;  %v567_v49 = vrot.slane %v271_v47, %v454_v45  ;;  %v462_v52 = vrot.slane %v269_v41, %v461_v50  ;;  %v574_v54 = vrot.slane %v271_v47, %v461_v50  ;;  %v441_v56 = vrot.slane %v269_v41, %v1576_v17  ;;  %s1115_s22 = scalar_lea.sflag [#allocation4], %s1531_s23  ;;  %s1322_s8 = scalar_lea.vmem %s1768_s12, 1024 }
  0x40   : > { %255 = vadd.xlane.f32.xlu0 %v254_v11  ;;  %v469_v58 = vrot.slane %v269_v41, %v468_v55  ;;  %v490_v59 = vrot.slane %v270_v57, %v1569_v14  ;;  %v581_v60 = vrot.slane %v271_v47, %v468_v55  ;;  %v497_v62 = vrot.slane %v270_v57, %v1576_v17  ;;  %p1323_p6 = scmp.ne.s32.totalorder %s1768_s12, %s1322_s8  ;;  %p1833_p11 = scmp.ne.s32.totalorder %s1830_s30, 0 }
  0x41   : > { %v476_v63 = vrot.slane %v269_v41, %v475_v61  ;;  %v546_v3 = vrot.slane %v271_v47, %v1569_v14  ;;  %v588_v7 = vrot.slane %v271_v47, %v475_v61  ;;  %v482_v10 = vsub.s32 7, %v1566_v13  ;;  %s1394_s7 = smov [#allocation5]  }
  0x42   : > { %v553_v11 = vrot.slane %v271_v47, %v1576_v17  ;;  %vm984_vm10 = vcmask 1046534   ;;  %vm986_vm11 = vcmask 1047559   ;;  %vm1013_vm12 = vcmask 15360   ;;  %p1324_p12 = pnand %p1323_p6, %p1833_p11  ;;  %s1326_s9 = sshll.u32 %s1394_s7, 4  ;;  %s1327_s9 = int_to_ptr.vmem [resolvable:$false] %s1326_s9 }
  0x43   : > { %v595_v19 = vrot.slane %v271_v47, %v482_v10  ;;  %s1328_s10 = scalar_lea.vmem %s1327_s9, 2048  ;;  %p1329_p8 = scmp.lt.s32.totalorder %s1768_s12, %s1327_s9 }
  0x44   : > { %p1325_p13 = pneg %p1324_p12  ;;  %p1330_p10 = scmp.lt.s32.totalorder %s1328_s10, %s1322_s8 }
  0x46   : > { %p1331_p0 = por %p1330_p10, %p1329_p8 }
  0x48   : > { %p1332_p2 = pnand %p1331_p0, %p1325_p13 }
  0x50   : > { %284 = vbcast.lane.b32.xlu1 %v278_v16, 264 }
  0x54   : > { %299 = vbcast.lane.b32.xlu1 %v297_v18, 256 }
  0x56   : > { %280 = vbcast.lane.b32.xlu0 %v278_v16, 256 }
  0x58   : > { %303 = vbcast.lane.b32.xlu1 %v297_v18, 264 }
  0x5a   : > { %288 = vbcast.lane.b32.xlu0 %v278_v16, 272 }
  0x5c   : > { %307 = vbcast.lane.b32.xlu1 %v297_v18, 272 }
  0x5e   : > { %292 = vbcast.lane.b32.xlu0 %v278_v16, 280  ;;  %v483_v16 = vrot.slane %v269_v41, %v482_v10 }
  0x60   : > { %311 = vbcast.lane.b32.xlu1 %v297_v18, 280  ;;  %v602_v18 = vrot.slane %v272_v15, %v1569_v14  ;;  %v518_v14 = vrot.slane %v270_v57, %v461_v50 }
  0xc8   : > { %v259_v20 = vpop.xlane.xlu1 %258 }
  0xc9   : > { %v253_v21 = vpop.xlane.xlu0 %252  ;;  %v265_v33 = vmul.f32 0.00390625, %v259_v20  ;;  %v609_v20 = vrot.slane %v272_v15, %v1576_v17  ;;  %v637_v17 = vrot.slane %v272_v15, %v468_v55 }
  0xca   : > { %v263_v25 = vmul.f32 0.00390625, %v253_v21  ;;  %v504_v21 = vrot.slane %v270_v57, %v447_v39 }
  0xcc   : > { %v262_v22 = vpop.xlane.xlu1 %261 }
  0xcd   : > { %v256_v23 = vpop.xlane.xlu0 %255  ;;  %v266_v38 = vmul.f32 0.00390625, %v262_v22  ;;  %v560_v22 = vrot.slane %v271_v47, %v447_v39 }
  0xce   : > { %v264_v24 = vmul.f32 0.00390625, %v256_v23  ;;  %v616_v23 = vrot.slane %v272_v15, %v447_v39 }
  0xd0   : > { %v285_v26 = vpop.permute.xlu1 %284 }
  0xd1   : > { %v322_v27 = vmul.f32 %v285_v26, %v264_v24  ;;  %v281_v28 = vpop.permute.xlu0 %280  ;;  %v623_v26 = vrot.slane %v272_v15, %v454_v45 }
  0xd2   : > { %v321_v29 = vmul.f32 %v281_v28, %v263_v25  ;;  %v525_v28 = vrot.slane %v270_v57, %v468_v55 }
  0xd3   : > { %341 = vperm.xlu1 %1275, %v322_v27   ;;  %v630_v27 = vrot.slane %v272_v15, %v461_v50 }
  0xd4   : > { %338 = vperm.xlu0 %1274, %v321_v29   ;;  %v300_v30 = vpop.permute.xlu1 %299  ;;  %v532_v29 = vrot.slane %v270_v57, %v475_v61 }
  0xd5   : > { %v325_v31 = vmul.f32 %v300_v30, %v263_v25  ;;  %v289_v32 = vpop.permute.xlu0 %288  ;;  %v511_v25 = vrot.slane %v270_v57, %v454_v45  ;;  %v644_v30 = vrot.slane %v272_v15, %v475_v61 }
  0xd6   : > { %v323_v35 = vmul.f32 %v289_v32, %v265_v33  ;;  %v651_v32 = vrot.slane %v272_v15, %v482_v10 }
  0xd7   : > { %350 = vperm.xlu1 %1275, %v325_v31   ;;  %v539_v31 = vrot.slane %v270_v57, %v482_v10 }
  0xd8   : > { %v304_v34 = vpop.permute.xlu1 %303 }
  0xd9   : > { %v326_v36 = vmul.f32 %v304_v34, %v264_v24  ;;  %v293_v37 = vpop.permute.xlu0 %292  ;;  %v455_v24 = vrot.slane %v269_v41, %v454_v45  ;;  %v362_v34 = vand.u32 127, %v275_v12 }
  0xda   : > { %v324_v42 = vmul.f32 %v293_v37, %v266_v38 }
  0xdb   : > { %353 = vperm.xlu0 %1274, %v326_v36   ;;  %344 = vperm.xlu1 %1275, %v323_v35   ;;  %v367_v37 = vadd.s32 4294967288, %v362_v34  ;;  %v381_v39 = vadd.s32 4294967272, %v362_v34 }
  0xdc   : > { %v308_v40 = vpop.permute.xlu1 %307 }
  0xdd   : > { %v327_v43 = vmul.f32 %v308_v40, %v265_v33  ;;  %v384_v45 = vsub.s32 %v381_v39, %v1566_v13 }
  0xdf   : > { %356 = vperm.xlu0 %1274, %v327_v43   ;;  %347 = vperm.xlu1 %1275, %v324_v42   ;;  %v1610_v42 = vsub.s32 %v362_v34, %v1566_v13  ;;  %v370_v43 = vsub.s32 %v367_v37, %v1566_v13 }
  0xe0   : > { %v312_v46 = vpop.permute.xlu1 %311 }
  0xe1   : > { %v328_v48 = vmul.f32 %v312_v46, %v266_v38  ;;  %v374_v38 = vadd.s32 4294967280, %v362_v34 }
  0xe3   : > { %359 = vperm.xlu0 %1274, %v328_v48   ;;  %450 = vbcast.lane.b32.xlu1 %v448_v44, 256  ;;  %v377_v44 = vsub.s32 %v374_v38, %v1566_v13 }
  0xe7   : > { %569 = vbcast.lane.b32.xlu1 %v567_v49, 256  ;;  %420 = vbcast.lane.b32.xlu0 %v1210_v51, 256 }
  0xeb   : > { %464 = vbcast.lane.b32.xlu1 %v462_v52, 256  ;;  %436 = vbcast.lane.b32.xlu0 %v434_v53, 256 }
  0xef   : > { %576 = vbcast.lane.b32.xlu1 %v574_v54, 256  ;;  %443 = vbcast.lane.b32.xlu0 %v441_v56, 256 }
  0xf3   : > { %471 = vbcast.lane.b32.xlu1 %v469_v58, 256  ;;  %492 = vbcast.lane.b32.xlu0 %v490_v59, 256 }
  0xf7   : > { %583 = vbcast.lane.b32.xlu1 %v581_v60, 256  ;;  %499 = vbcast.lane.b32.xlu0 %v497_v62, 256 }
  0xfb   : > { %478 = vbcast.lane.b32.xlu1 %v476_v63, 256  ;;  %548 = vbcast.lane.b32.xlu0 %v546_v3, 256 }
  0xff   : > { %590 = vbcast.lane.b32.xlu1 %v588_v7, 256  ;;  %555 = vbcast.lane.b32.xlu0 %v553_v11, 256 }
 0x103   : > { %485 = vbcast.lane.b32.xlu1 %v483_v16, 256  ;;  %604 = vbcast.lane.b32.xlu0 %v602_v18, 256 }
 0x107   : > { %597 = vbcast.lane.b32.xlu1 %v595_v19, 256  ;;  %611 = vbcast.lane.b32.xlu0 %v609_v20, 256 }
 0x10b   : > { %506 = vbcast.lane.b32.xlu0 %v504_v21, 256 }
 0x10f   : > { %562 = vbcast.lane.b32.xlu0 %v560_v22, 256 }
 0x113   : > { %618 = vbcast.lane.b32.xlu0 %v616_v23, 256 }
 0x117   : > { %457 = vbcast.lane.b32.xlu0 %v455_v24, 256 }
 0x11b   : > { %513 = vbcast.lane.b32.xlu0 %v511_v25, 256 }
 0x11f   : > { %625 = vbcast.lane.b32.xlu0 %v623_v26, 256 }
 0x123   : > { %520 = vbcast.lane.b32.xlu0 %v518_v14, 256 }
 0x127   : > { %632 = vbcast.lane.b32.xlu0 %v630_v27, 256 }
 0x12b   : > { %527 = vbcast.lane.b32.xlu0 %v525_v28, 256 }
 0x12f   : > { %639 = vbcast.lane.b32.xlu0 %v637_v17, 256 }
 0x133   : > { %534 = vbcast.lane.b32.xlu0 %v532_v29, 256 }
 0x137   : > { %646 = vbcast.lane.b32.xlu0 %v644_v30, 256 }
 0x13b   : > { %541 = vbcast.lane.b32.xlu0 %v539_v31, 256 }
 0x13f   : > { %653 = vbcast.lane.b32.xlu0 %v651_v32, 256 }
 0x152   : > { %v342_v33 = vpop.permute.xlu1 %341 }
 0x153   : > { %v339_v35 = vpop.permute.xlu0 %338  ;;  %v371_v48 = vrot.slane %v342_v33, %v370_v43 }
 0x154   : > { %v366_v12 = vrot.slane %v339_v35, %v1610_v42 }
 0x156   : > { %v351_v36 = vpop.permute.xlu1 %350  ;;  %v373_v55 = vsel %vm372_vm0, %v371_v48, %v366_v12 }
 0x157   : > { %v391_v52 = vrot.slane %v351_v36, %v1610_v42 }
 0x15a   : > { %v345_v40 = vpop.permute.xlu1 %344  ;;  %v354_v41 = vpop.permute.xlu0 %353 }
 0x15b   : > { %v395_v49 = vrot.slane %v354_v41, %v370_v43  ;;  %v378_v50 = vrot.slane %v345_v40, %v377_v44 }
 0x15d   : > { %v396_v56 = vsel %vm372_vm0, %v395_v49, %v391_v52  ;;  %v380_v13 = vsel %vm379_vm1, %v378_v50, %v373_v55 }
 0x15e   : > { %v348_v46 = vpop.permute.xlu1 %347  ;;  %v357_v47 = vpop.permute.xlu0 %356 }
 0x15f   : > { %v400_v51 = vrot.slane %v357_v47, %v377_v44  ;;  %v385_v53 = vrot.slane %v348_v46, %v384_v45 }
 0x161   : > { %v401_v58 = vsel %vm379_vm1, %v400_v51, %v396_v56  ;;  %v387_v59 = vsel %vm386_vm2, %v385_v53, %v380_v13 }
 0x162   : > { %v360_v54 = vpop.permute.xlu0 %359  ;;  %v451_v7 = vpop.permute.xlu1 %450 }
 0x163   : > { %v405_v57 = vrot.slane %v360_v54, %v384_v45 }
 0x165   : > { %v406_v60 = vsel %vm386_vm2, %v405_v57, %v401_v58 }
 0x166   : > { %v408_v61 = vsel %vm407_vm3, %v406_v60, %v387_v59  ;;  %v421_v63 = vpop.permute.xlu0 %420  ;;  %v570_v11 = vpop.permute.xlu1 %569 }
 0x167   : > { %v411_v62 = vsel %vm410_vm4, %v408_v61, 0.0 }
 0x168   : > { %412 = vadd.xlane.f32.xlu1 %v411_v62 }
 0x16a   : > { %v437_v3 = vpop.permute.xlu0 %436  ;;  %v465_v16 = vpop.permute.xlu1 %464 }
 0x16e   : > { %v444_v10 = vpop.permute.xlu0 %443  ;;  %v577_v19 = vpop.permute.xlu1 %576 }
 0x172   : > { %v493_v15 = vpop.permute.xlu0 %492  ;;  %v1618_v21 = vpop.permute.xlu1 %471 }
 0x176   : > { %v500_v18 = vpop.permute.xlu0 %499  ;;  %v1620_v23 = vpop.permute.xlu1 %583 }
 0x17a   : > { %v549_v20 = vpop.permute.xlu0 %548  ;;  %v1622_v25 = vpop.permute.xlu1 %478 }
 0x17e   : > { %v556_v22 = vpop.permute.xlu0 %555  ;;  %v1624_v14 = vpop.permute.xlu1 %590 }
 0x182   : > { %v605_v24 = vpop.permute.xlu0 %604  ;;  %v1626_v28 = vpop.permute.xlu1 %485 }
 0x186   : > { %v612_v26 = vpop.permute.xlu0 %611  ;;  %v1628_v29 = vpop.permute.xlu1 %597 }
 0x18a   : > { %v507_v27 = vpop.permute.xlu0 %506 }
 0x18e   : > { %v563_v17 = vpop.permute.xlu0 %562 }
 0x192   : > { %v619_v30 = vpop.permute.xlu0 %618 }
 0x196   : > { %v458_v34 = vpop.permute.xlu0 %457 }
 0x19a   : > { %v514_v38 = vpop.permute.xlu0 %513 }
 0x19e   : > { %v626_v44 = vpop.permute.xlu0 %625 }
 0x1a2   : > { %v521_v47 = vpop.permute.xlu0 %520 }
 0x1a6   : > { %v633_v51 = vpop.permute.xlu0 %632 }
 0x1aa   : > { %v528_v54 = vpop.permute.xlu0 %527 }
 0x1ae   : > { %v640_v58 = vpop.permute.xlu0 %639 }
 0x1b2   : > { %v535_v61 = vpop.permute.xlu0 %534 }
 0x1f5   : > { %v413_v31 = vpop.xlane.xlu1 %412 }
 0x1f6   : > { %v423_v32 = vadd.f32 %v421_v63, %v413_v31 }
 0x1f8   : > { %vm424_vm5 = vcmp.ge.f32.partialorder %v423_v32, 0.0  ;;  %v425_v33 = vmul.f32 0.01, %v423_v32 }
 0x1fa   : > { %v1630_v35 = vsel %vm424_vm5, %v423_v32, %v425_v33 }
 0x1fb   : > { %v687_v36 = vmul.f32 %v437_v3, %v1630_v35  ;;  %v688_v37 = vmul.f32 %v444_v10, %v1630_v35  ;;  %v695_v39 = vmul.f32 %v493_v15, %v1630_v35  ;;  %v696_v40 = vmul.f32 %v500_v18, %v1630_v35  ;;  %v647_v10 = vpop.permute.xlu0 %646 }
 0x1fc   : > { %v703_v41 = vmul.f32 %v549_v20, %v1630_v35  ;;  %v704_v43 = vmul.f32 %v556_v22, %v1630_v35  ;;  %v711_v45 = vmul.f32 %v605_v24, %v1630_v35  ;;  %v712_v46 = vmul.f32 %v612_v26, %v1630_v35 }
 0x1fd   : > { %752 = vperm.xlu1 %1275, %v687_v36   ;;  %755 = vperm.xlu0 %1274, %v688_v37   ;;  %v689_v48 = vmul.f32 %v451_v7, %v1630_v35  ;;  %v697_v12 = vmul.f32 %v507_v27, %v1630_v35  ;;  %v705_v49 = vmul.f32 %v563_v17, %v1630_v35 }
 0x1fe   : > { %v713_v50 = vmul.f32 %v619_v30, %v1630_v35  ;;  %v690_v52 = vmul.f32 %v458_v34, %v1630_v35  ;;  %v698_v53 = vmul.f32 %v514_v38, %v1630_v35  ;;  %v706_v55 = vmul.f32 %v570_v11, %v1630_v35 }
 0x1ff   : > { %v714_v56 = vmul.f32 %v626_v44, %v1630_v35  ;;  %v691_v57 = vmul.f32 %v465_v16, %v1630_v35  ;;  %v699_v13 = vmul.f32 %v521_v47, %v1630_v35  ;;  %v707_v59 = vmul.f32 %v577_v19, %v1630_v35  ;;  %v542_v18 = vpop.permute.xlu0 %541 }
 0x200   : > { %v715_v60 = vmul.f32 %v633_v51, %v1630_v35  ;;  %v692_v62 = vmul.f32 %v1618_v21, %v1630_v35  ;;  %v700_v63 = vmul.f32 %v528_v54, %v1630_v35  ;;  %v708_v3 = vmul.f32 %v1620_v23, %v1630_v35 }
 0x201   : > { %776 = vperm.xlu1 %1275, %v695_v39   ;;  %779 = vperm.xlu0 %1274, %v696_v40   ;;  %v716_v7 = vmul.f32 %v640_v58, %v1630_v35  ;;  %v693_v11 = vmul.f32 %v1622_v25, %v1630_v35  ;;  %v701_v15 = vmul.f32 %v535_v61, %v1630_v35  ;;  %v1673_v25 = vld [vmem:[%s1825_s4] ss:$0 sm:$0xff] }
 0x202   : > { %v709_v16 = vmul.f32 %v1624_v14, %v1630_v35  ;;  %v717_v19 = vmul.f32 %v647_v10, %v1630_v35  ;;  %v694_v20 = vmul.f32 %v1626_v28, %v1630_v35  ;;  %v702_v21 = vmul.f32 %v542_v18, %v1630_v35 }
 0x203   : > { %v654_v22 = vpop.permute.xlu0 %653  ;;  %v710_v23 = vmul.f32 %v1628_v29, %v1630_v35 }
 0x204   : > { %v718_v24 = vmul.f32 %v654_v22, %v1630_v35 }
 0x205   : > { %800 = vperm.xlu1 %1275, %v703_v41   ;;  %803 = vperm.xlu0 %1274, %v704_v43  }
 0x209   : > { %824 = vperm.xlu1 %1275, %v711_v45   ;;  %827 = vperm.xlu0 %1274, %v712_v46  }
 0x20d   : > { %758 = vperm.xlu1 %1275, %v689_v48   ;;  %782 = vperm.xlu0 %1274, %v697_v12  }
 0x211   : > { %806 = vperm.xlu1 %1275, %v705_v49   ;;  %830 = vperm.xlu0 %1274, %v713_v50  }
 0x215   : > { %761 = vperm.xlu1 %1275, %v690_v52   ;;  %785 = vperm.xlu0 %1274, %v698_v53  }
 0x219   : > { %809 = vperm.xlu1 %1275, %v706_v55   ;;  %833 = vperm.xlu0 %1274, %v714_v56  }
 0x21d   : > { %764 = vperm.xlu1 %1275, %v691_v57   ;;  %788 = vperm.xlu0 %1274, %v699_v13  }
 0x221   : > { %812 = vperm.xlu1 %1275, %v707_v59   ;;  %836 = vperm.xlu0 %1274, %v715_v60  }
 0x225   : > { %767 = vperm.xlu1 %1275, %v692_v62   ;;  %791 = vperm.xlu0 %1274, %v700_v63  }
 0x229   : > { %815 = vperm.xlu1 %1275, %v708_v3   ;;  %839 = vperm.xlu0 %1274, %v716_v7  }
 0x22d   : > { %770 = vperm.xlu1 %1275, %v693_v11   ;;  %794 = vperm.xlu0 %1274, %v701_v15  }
 0x231   : > { %818 = vperm.xlu1 %1275, %v709_v16   ;;  %842 = vperm.xlu0 %1274, %v717_v19  }
 0x235   : > { %773 = vperm.xlu1 %1275, %v694_v20   ;;  %797 = vperm.xlu0 %1274, %v702_v21  }
 0x239   : > { %821 = vperm.xlu1 %1275, %v710_v23   ;;  %845 = vperm.xlu0 %1274, %v718_v24  }
 0x23d   : > { %1036 = vbcast.lane.b32.xlu1 %v1673_v25, 264  ;;  %1032 = vbcast.lane.b32.xlu0 %v1673_v25, 256 }
 0x27c   : > { %v753_v26 = vpop.permute.xlu1 %752  ;;  %v756_v14 = vpop.permute.xlu0 %755 }
 0x27d   : > { %v850_v12 = vrot.slane %v753_v26, %v1610_v42  ;;  %v854_v49 = vrot.slane %v756_v14, %v1610_v42 }
 0x27f   : > { %v975_v62 = vsel %vm407_vm3, %v854_v49, %v850_v12 }
 0x280   : > { %v777_v27 = vpop.permute.xlu1 %776  ;;  %v780_v28 = vpop.permute.xlu0 %779 }
 0x281   : > { %v882_v50 = vrot.slane %v777_v27, %v1610_v42  ;;  %v886_v51 = vrot.slane %v780_v28, %v1610_v42 }
 0x283   : > { %v988_v63 = vsel %vm407_vm3, %v886_v51, %v882_v50 }
 0x284   : > { %v801_v17 = vpop.permute.xlu1 %800  ;;  %v804_v30 = vpop.permute.xlu0 %803 }
 0x285   : > { %v914_v52 = vrot.slane %v801_v17, %v1610_v42  ;;  %v918_v53 = vrot.slane %v804_v30, %v1610_v42 }
 0x287   : > { %v995_v7 = vsel %vm407_vm3, %v918_v53, %v914_v52 }
 0x288   : > { %v825_v29 = vpop.permute.xlu1 %824  ;;  %v828_v31 = vpop.permute.xlu0 %827 }
 0x289   : > { %v946_v54 = vrot.slane %v825_v29, %v1610_v42  ;;  %v950_v55 = vrot.slane %v828_v31, %v1610_v42 }
 0x28b   : > { %v1002_v10 = vsel %vm407_vm3, %v950_v55, %v946_v54 }
 0x28c   : > { %v759_v32 = vpop.permute.xlu1 %758  ;;  %v783_v33 = vpop.permute.xlu0 %782 }
 0x28d   : > { %v858_v57 = vrot.slane %v759_v32, %v1610_v42  ;;  %v890_v13 = vrot.slane %v783_v33, %v1610_v42 }
 0x28f   : > { %v977_v18 = vsel %vm976_vm6, %v858_v57, %v975_v62  ;;  %v989_v19 = vsel %vm976_vm6, %v890_v13, %v988_v63 }
 0x290   : > { %v807_v34 = vpop.permute.xlu1 %806  ;;  %v831_v35 = vpop.permute.xlu0 %830 }
 0x291   : > { %v922_v59 = vrot.slane %v807_v34, %v1610_v42  ;;  %v954_v60 = vrot.slane %v831_v35, %v1610_v42 }
 0x293   : > { %v996_v23 = vsel %vm976_vm6, %v922_v59, %v995_v7  ;;  %v1003_v24 = vsel %vm976_vm6, %v954_v60, %v1002_v10 }
 0x294   : > { %v762_v36 = vpop.permute.xlu1 %761  ;;  %v786_v37 = vpop.permute.xlu0 %785 }
 0x295   : > { %v862_v61 = vrot.slane %v762_v36, %v1610_v42  ;;  %v894_v3 = vrot.slane %v786_v37, %v1610_v42 }
 0x297   : > { %v979_v26 = vsel %vm978_vm7, %v862_v61, %v977_v18  ;;  %v990_v27 = vsel %vm978_vm7, %v894_v3, %v989_v19 }
 0x298   : > { %v1677_v38 = vpop.permute.xlu1 %809  ;;  %v1679_v39 = vpop.permute.xlu0 %833 }
 0x299   : > { %v926_v28 = vrot.slane %v1677_v38, %v1610_v42  ;;  %v958_v17 = vrot.slane %v1679_v39, %v1610_v42 }
 0x29b   : > { %v1004_v49 = vsel %vm978_vm7, %v958_v17, %v1003_v24 }
 0x29c   : > { %v765_v40 = vpop.permute.xlu1 %764  ;;  %v789_v41 = vpop.permute.xlu0 %788 }
 0x29d   : > { %v866_v11 = vrot.slane %v765_v40, %v1610_v42  ;;  %v898_v15 = vrot.slane %v789_v41, %v1610_v42 }
 0x29f   : > { %v981_v29 = vsel %vm980_vm8, %v866_v11, %v979_v26  ;;  %v991_v31 = vsel %vm980_vm8, %v898_v15, %v990_v27 }
 0x2a0   : > { %v1681_v43 = vpop.permute.xlu1 %812  ;;  %v1683_v44 = vpop.permute.xlu0 %836 }
 0x2a1   : > { %v930_v32 = vrot.slane %v1681_v43, %v1610_v42  ;;  %v962_v33 = vrot.slane %v1683_v44, %v1610_v42 }
 0x2a3   : > { %v1005_v53 = vsel %vm980_vm8, %v962_v33, %v1004_v49 }
 0x2a4   : > { %v768_v45 = vpop.permute.xlu1 %767  ;;  %v792_v46 = vpop.permute.xlu0 %791 }
 0x2a5   : > { %v870_v20 = vrot.slane %v768_v45, %v1610_v42  ;;  %v902_v21 = vrot.slane %v792_v46, %v1610_v42  ;;  %v997_v45 = vsel %vm978_vm7, %v926_v28, %v996_v23 }
 0x2a6   : > { %v998_v50 = vsel %vm980_vm8, %v930_v32, %v997_v45 }
 0x2a7   : > { %v983_v35 = vsel %vm982_vm9, %v870_v20, %v981_v29  ;;  %v992_v36 = vsel %vm982_vm9, %v902_v21, %v991_v31 }
 0x2a8   : > { %v1685_v47 = vpop.permute.xlu1 %815  ;;  %v1687_v48 = vpop.permute.xlu0 %839 }
 0x2a9   : > { %v934_v37 = vrot.slane %v1685_v47, %v1610_v42  ;;  %v966_v40 = vrot.slane %v1687_v48, %v1610_v42 }
 0x2ab   : > { %v999_v54 = vsel %vm982_vm9, %v934_v37, %v998_v50  ;;  %v1006_v13 = vsel %vm982_vm9, %v966_v40, %v1005_v53 }
 0x2ac   : > { %v771_v56 = vpop.permute.xlu1 %770  ;;  %v795_v58 = vpop.permute.xlu0 %794 }
 0x2ad   : > { %v874_v14 = vrot.slane %v771_v56, %v1610_v42  ;;  %v906_v30 = vrot.slane %v795_v58, %v1610_v42 }
 0x2af   : > { %v985_v44 = vsel %vm984_vm10, %v874_v14, %v983_v35  ;;  %v993_v47 = vsel %vm984_vm10, %v906_v30, %v992_v36 }
 0x2b0   : > { %v819_v16 = vpop.permute.xlu1 %818  ;;  %v843_v22 = vpop.permute.xlu0 %842 }
 0x2b1   : > { %v938_v41 = vrot.slane %v819_v16, %v1610_v42  ;;  %v970_v46 = vrot.slane %v843_v22, %v1610_v42 }
 0x2b3   : > { %v1000_v59 = vsel %vm984_vm10, %v938_v41, %v999_v54  ;;  %v1007_v61 = vsel %vm984_vm10, %v970_v46, %v1006_v13 }
 0x2b4   : > { %v774_v34 = vpop.permute.xlu1 %773  ;;  %v798_v39 = vpop.permute.xlu0 %797 }
 0x2b5   : > { %v878_v38 = vrot.slane %v774_v34, %v1610_v42  ;;  %v910_v43 = vrot.slane %v798_v39, %v1610_v42 }
 0x2b7   : > { %v987_v12 = vsel %vm986_vm11, %v878_v38, %v985_v44  ;;  %v994_v52 = vsel %vm986_vm11, %v910_v43, %v993_v47 }
 0x2b8   : > { %v822_v51 = vpop.permute.xlu1 %821  ;;  %v1014_v48 = vsel %vm1013_vm12, %v987_v12, 0.0  ;;  %v846_v56 = vpop.permute.xlu0 %845  ;;  %v1017_v57 = vsel %vm1013_vm12, %v994_v52, 0.0 }
 0x2b9   : > { %v942_v55 = vrot.slane %v822_v51, %v1610_v42  ;;  %1015 = vadd.xlane.f32.xlu1 %v1014_v48  ;;  %v974_v58 = vrot.slane %v846_v56, %v1610_v42  ;;  %1018 = vadd.xlane.f32.xlu0 %v1017_v57 }
 0x2bb   : > { %v1001_v60 = vsel %vm986_vm11, %v942_v55, %v1000_v59  ;;  %v1008_v63 = vsel %vm986_vm11, %v974_v58, %v1007_v61 }
 0x2bc   : > { %v1020_v62 = vsel %vm1013_vm12, %v1001_v60, 0.0  ;;  %v1023_v3 = vsel %vm1013_vm12, %v1008_v63, 0.0  ;;  %v1037_v42 = vpop.permute.xlu1 %1036  ;;  %v1033_v7 = vpop.permute.xlu0 %1032 }
 0x2bd   : > { %1021 = vadd.xlane.f32.xlu0 %v1020_v62  ;;  %1024 = vadd.xlane.f32.xlu1 %v1023_v3 }
 0x2ce   : > { %1040 = vbcast.lane.b32.xlu1 %v1673_v25, 272 }
 0x2d3   : > { %1044 = vbcast.lane.b32.xlu0 %v1673_v25, 280 }
 0x346   : > { %v1016_v10 = vpop.xlane.xlu1 %1015  ;;  %v1019_v15 = vpop.xlane.xlu0 %1018 }
 0x347   : > { %v1050_v11 = vadd.f32 %v1033_v7, %v1016_v10  ;;  %v1051_v16 = vadd.f32 %v1037_v42, %v1019_v15 }
 0x349   : > { %v1212_v18 = vmul.f32 -1.442695, %v1050_v11  ;;  %v1213_v19 = vmul.f32 -1.442695, %v1051_v16 }
 0x34a   : > { %v1025_v20 = vpop.xlane.xlu1 %1024  ;;  %v1022_v21 = vpop.xlane.xlu0 %1021 }
 0x34b   : > { %1276 = vpow2.f32 %v1212_v18 }
 0x34c   : > { %1278 = vpow2.f32 %v1213_v19 }
 0x34e   : > { %v1041_v22 = vpop.permute.xlu1 %1040  ;;  %v1045_v23 = vpop.permute.xlu0 %1044 }
 0x34f   : > { %v1052_v24 = vadd.f32 %v1041_v22, %v1022_v21  ;;  %v1053_v26 = vadd.f32 %v1045_v23, %v1025_v20 }
 0x351   : > { %v1214_v14 = vmul.f32 -1.442695, %v1052_v24  ;;  %v1215_v27 = vmul.f32 -1.442695, %v1053_v26 }
 0x353   : > { %1280 = vpow2.f32 %v1214_v14 }
 0x354   : > { %1282 = vpow2.f32 %v1215_v27 }
 0x355   : > { %v1277_v25 = vpop.eup %1276 }
 0x356   : > { %v1279_v28 = vpop.eup %1278  ;;  %v1066_v17 = vadd.f32 1.0, %v1277_v25 }
 0x357   : > { %v1067_v30 = vadd.f32 1.0, %v1279_v28 }
 0x358   : > { %1284 = vrcp.f32 %v1066_v17 }
 0x359   : > { %1286 = vrcp.f32 %v1067_v30 }
 0x35d   : > { %v1281_v29 = vpop.eup %1280 }
 0x35e   : > { %v1283_v31 = vpop.eup %1282  ;;  %v1068_v32 = vadd.f32 1.0, %v1281_v29 }
 0x35f   : > { %v1069_v33 = vadd.f32 1.0, %v1283_v31 }
 0x360   : > { %1288 = vrcp.f32 %v1068_v32 }
 0x361   : > { %1290 = vrcp.f32 %v1069_v33 }
 0x362   : > { %v1285_v34 = vpop.eup %1284 }
 0x363   : > { %v1287_v35 = vpop.eup %1286  ;;  %1080 = vperm.xlu1 %1275, %v1285_v34  }
 0x364   : > { %1085 = vperm.xlu0 %1274, %v1287_v35  }
 0x36a   : > { %v1289_v36 = vpop.eup %1288 }
 0x36b   : > { %v1291_v37 = vpop.eup %1290  ;;  %1090 = vperm.xlu1 %1275, %v1289_v36  }
 0x36c   : > { %1095 = vperm.xlu0 %1274, %v1291_v37  }
 0x3e2   : > { %v1081_v38 = vpop.permute.xlu1 %1080 }
 0x3e3   : > { %v1098_v39 = vmul.f32 %v1081_v38, %v1545_v2  ;;  %v1099_v40 = vmul.f32 %v1081_v38, %v1549_v4  ;;  %v1086_v41 = vpop.permute.xlu0 %1085 }
 0x3e4   : > { %v1100_v43 = vmul.f32 %v1086_v41, %v1557_v8  ;;  %v1101_v44 = vmul.f32 %v1086_v41, %v1559_v9 }
 0x3e5   : > { %1106 = vst [vmem:[%s242_s29] sm:$0xff] %v1098_v39  ;;  %1107 = vst [vmem:[%s242_s29 + $0x8] sm:$0xff] %v1099_v40 }
 0x3e6   : > { %1108 = vst [vmem:[%s242_s29 + $0x10] sm:$0xff] %v1100_v43  ;;  %1109 = vst [vmem:[%s242_s29 + $0x18] sm:$0xff] %v1101_v44 }
 0x3ea   : > { %v1091_v2 = vpop.permute.xlu1 %1090 }
 0x3eb   : > { %v1102_v4 = vmul.f32 %v1091_v2, %v1541_v0  ;;  %v1103_v8 = vmul.f32 %v1091_v2, %v1543_v1  ;;  %v1096_v9 = vpop.permute.xlu0 %1095 }
 0x3ec   : > { %v1104_v45 = vmul.f32 %v1096_v9, %v1551_v5  ;;  %v1105_v46 = vmul.f32 %v1096_v9, %v1553_v6 }
 0x3ed   : > { %1110 = vst [vmem:[%s242_s29 + $0x20] sm:$0xff] %v1102_v4  ;;  %1111 = vst [vmem:[%s242_s29 + $0x28] sm:$0xff] %v1103_v8 }
 0x3ee   : > { %1112 = vst [vmem:[%s242_s29 + $0x30] sm:$0xff] %v1104_v45  ;;  %1113 = vst [vmem:[%s242_s29 + $0x38] sm:$0xff] %v1105_v46 }
 0x3ef   : > { %1335 = shalt.err (!%p1332_p2)
}
 0x3f0   : > { %s1336_s11 = scalar_lea.hbm %s1775_s16, 1024  ;;  %s1340_s26 = scalar_lea.hbm %s1826_s5, 2048 }
 0x3f1   : > { %p1337_p4 = scmp.ne.s32.totalorder %s1775_s16, %s1336_s11  ;;  %p1341_p9 = scmp.lt.u32.totalorder %s1775_s16, %s1826_s5 }
 0x3f2   : > { %p1342_p1 = scmp.lt.u32.totalorder %s1340_s26, %s1336_s11  ;;  %p1344_p6 = scmp.lt.u32.totalorder %s1336_s11, %s1775_s16 }
 0x3f3   : > { %p1338_p5 = pnand %p1337_p4, %p1833_p11 }
 0x3f4   : > { %p1343_p3 = por %p1342_p1, %p1341_p9 }
 0x3f5   : > { %p1339_p7 = pneg %p1338_p5 }
 0x3f6   : > { %p1345_p12 = por %p1344_p6, %p1343_p3 }
 0x3f8   : > { %p1346_p13 = pnand %p1345_p12, %p1339_p7 }
 0x3fa   : > { %1349 = shalt.err (!%p1346_p13)
}
 0x3fb   : > { %s1395_s14 = smov 256   ;;  %s1396_s15 = smov 16  }
 0x3fc   : > { %1225 = dma.vmem_to_hbm [thread:$0]  (%p1833_p11), %s1768_s12, 1024, %s1775_s16, %s1115_s22, %s1395_s14, %s1395_s14, %s1396_s15  }
 0x3fd PF: > { %s1143_s25 = sand.u32 1, %s1376_s18   ;;  %p1834_p8 = scmp.ne.s32.totalorder %s1831_s6, 0 }
 0x3fe   : > { %p1835_p10 = scmp.ge.s32.totalorder %s1388_s21, 2  ;;  %s1144_s8 = scalar_lea.sflag [#allocation4], %s1143_s25 }
 0x400   : > { %p1232_p0 = pnand %p1835_p10, %p1834_p8 }
 0x402   : > { %1371 = dma.done.wait (!%p1232_p0), %s1144_s8, 1024  }
 0x403   : > { %1373 = vsyncadd (!%p1232_p0), %s1144_s8, 4294966272  ;;  %p18_p2 = scmp.ge.s32.totalorder %s1452_s24, 4   ;;  %s1836_s18 = smov %s1380_s19 }
 0x404   : > { %s1837_s19 = smov %s1384_s20  ;;  %s1838_s20 = smov %s1464_s27 }
 0x405   : > { %s1839_s21 = smov %s1452_s24  ;;  %20 = sbr.rel (!%p18_p2) target bundleno = 5 (0x5), region = 85 }
 0x40c   :  { %1149 = vsyncpa [#allocation3], 1 }
 0x40d   :  { %1151 = vsyncpa [#allocation3 + $0x1], 1 }
 0x40e   :  { %1152 = vsyncpa [#allocation4], 1 }
 0x40f   :  { %1154 = vsyncpa [#allocation4 + $0x1], 1 }

</bundles_post_ra>
